<compile_context>
chip_gen: v6e
topology: v6e:2x2x1
jax: 0.10.0
libtpu: 0.0.40
codegen_flags: <defaults>
</compile_context>

<pallas_src>
import functools

import jax
import jax.numpy as jnp
from jax.experimental import pallas as pl
from jax.experimental.pallas import tpu as pltpu


def _round_up(x, m):
    return (x + m - 1) // m * m


def _external_attention_kernel(q_ref, wk_ref, wv_ref, o_ref, m_ref, l_ref, *,
                               s_valid):
    # q_ref:  (1, TN, D)      bfloat-castable query tile for (batch b, tile nt)
    # wk_ref: (D, S_pad)      resident bf16 weight (mk.weight.T, zero-padded)
    # wv_ref: (S_pad, D)      resident bf16 weight (mv.weight.T, zero-padded)
    # o_ref:  (1, TN, D)      output tile
    # m_ref:  (1, S_pad) f32  running column max   (persistent scratch)
    # l_ref:  (1, S_pad) f32  running column sum-of-exp (persistent scratch)
    p = pl.program_id(1)    # 0 = stats pass, 1 = output pass
    nt = pl.program_id(2)   # N-tile index

    # Logits for this tile; recomputed in both passes (bf16 MXU feeds, f32 acc).
    q = q_ref[0].astype(jnp.bfloat16)                                   # (TN, D)
    a = jnp.dot(q, wk_ref[...], preferred_element_type=jnp.float32)    # (TN, S_pad)

    @pl.when(p == 0)
    def _pass0():
        @pl.when(nt == 0)
        def _init():
            m_ref[...] = jnp.full_like(m_ref, -jnp.inf)
            l_ref[...] = jnp.zeros_like(l_ref)

        m_prev = m_ref[...]                                             # (1, S_pad)
        m_new = jnp.maximum(m_prev, jnp.max(a, axis=0, keepdims=True))
        l_ref[...] = (l_ref[...] * jnp.exp(m_prev - m_new)
                      + jnp.sum(jnp.exp(a - m_new), axis=0, keepdims=True))
        m_ref[...] = m_new

    @pl.when(p == 1)
    def _pass1():
        # Column softmax over the full sequence axis N (stats from pass 0).
        inv_l = pl.reciprocal(l_ref[...], approx=True)                  # EUP, (1, S_pad)
        e = jnp.exp(a - m_ref[...]) * inv_l                             # (TN, S_pad)

        # Row renorm over the *valid* S columns only (exclude lane padding).
        s_pad = e.shape[-1]
        if s_valid != s_pad:
            col = jax.lax.broadcasted_iota(jnp.int32, (1, s_pad), 1)
            row_sum = jnp.sum(jnp.where(col < s_valid, e, 0.0),
                              axis=1, keepdims=True)
        else:
            row_sum = jnp.sum(e, axis=1, keepdims=True)
        inv_row = pl.reciprocal(row_sum, approx=True)                   # EUP, (TN, 1)

        attn = (e * inv_row).astype(jnp.bfloat16)
        out = jnp.dot(attn, wv_ref[...], preferred_element_type=jnp.float32)
        o_ref[0] = out.astype(o_ref.dtype)


def external_attention(queries, wk, wv, *, tn=None):
    """queries: (B, N, d_model), wk: (d_model, S) = mk.weight.T,
    wv: (S, d_model) = mv.weight.T."""
    B, N, D = queries.shape
    Dk, S = wk.shape
    assert Dk == D and wv.shape == (S, D)

    # N-tile size: big enough to amortize per-step overhead, small enough that
    # double-buffered q/out tiles + weights + the (TN, S_pad) attn intermediate
    # fit comfortably inside v7x's 64 MiB VMEM.
    if tn is None:
        tn = 512
    tn = min(tn, N)
    if N % tn != 0:
        tn = N                      # fallback: single full-N tile (still correct)
    n_tiles = N // tn

    # Pad S to a lane multiple (128) so the attn tile / MXU output is full width.
    s_pad = max(_round_up(S, 128), 128)
    wk_p, wv_p = wk, wv
    if s_pad != S:
        wk_p = jnp.pad(wk, ((0, 0), (0, s_pad - S)))
        wv_p = jnp.pad(wv, ((0, s_pad - S), (0, 0)))
    wk_p = wk_p.astype(jnp.bfloat16)
    wv_p = wv_p.astype(jnp.bfloat16)

    kernel = functools.partial(_external_attention_kernel, s_valid=S)

    q_bytes = B * N * D * queries.dtype.itemsize
    o_bytes = B * N * D * queries.dtype.itemsize
    w_bytes = (wk_p.size + wv_p.size) * 2
    cost = pl.CostEstimate(
        flops=6 * B * N * D * s_pad,         # qk matmul twice (2 passes) + wv matmul
        transcendentals=2 * B * N * s_pad,   # exp in both passes
        bytes_accessed=2 * q_bytes + w_bytes + o_bytes,
    )

    return pl.pallas_call(
        kernel,
        out_shape=jax.ShapeDtypeStruct((B, N, D), queries.dtype),
        grid_spec=pltpu.PrefetchScalarGridSpec(
            num_scalar_prefetch=0,
            grid=(B, 2, n_tiles),
            in_specs=[
                pl.BlockSpec((1, tn, D), lambda b, p, nt: (b, nt, 0)),
                pl.BlockSpec((D, s_pad), lambda b, p, nt: (0, 0)),
                pl.BlockSpec((s_pad, D), lambda b, p, nt: (0, 0)),
            ],
            # During pass 0 the output block index is pinned at (b, 0, 0), which
            # is also the first block pass 1 writes, so no un-written tile is
            # ever flushed to HBM; every output block's visits are consecutive.
            out_specs=pl.BlockSpec((1, tn, D), lambda b, p, nt: (b, nt * p, 0)),
            scratch_shapes=[
                pltpu.VMEM((1, s_pad), jnp.float32),   # running column max
                pltpu.VMEM((1, s_pad), jnp.float32),   # running column sum-of-exp
            ],
        ),
        compiler_params=pltpu.CompilerParams(
            dimension_semantics=("parallel", "arbitrary", "arbitrary"),
            vmem_limit_bytes=64 * 1024 * 1024,
        ),
        cost_estimate=cost,
    )(queries, wk_p, wv_p)


def reference(queries, wk, wv):
    attn = jnp.einsum("bnd,ds->bns", queries, wk)
    attn = jax.nn.softmax(attn, axis=1)
    attn = attn / jnp.sum(attn, axis=2, keepdims=True)
    return jnp.einsum("bns,sd->bnd", attn, wv)


if __name__ == "__main__":
    B, N, D, S = 2, 256, 128, 64
    TN = 128   # 2 N-tiles -> exercises the cross-tile two-pass softmax

    key = jax.random.PRNGKey(0)
    kq, kk, kv = jax.random.split(key, 3)

    queries = jax.random.normal(kq, (B, N, D), dtype=jnp.float32)
    # nn.Linear init: normal(std=0.001), no bias.  Stored pre-transposed.
    wk = 0.001 * jax.random.normal(kk, (D, S), dtype=jnp.float32)   # mk.weight.T
    wv = 0.001 * jax.random.normal(kv, (S, D), dtype=jnp.float32)   # mv.weight.T

    out = external_attention(queries, wk, wv, tn=TN)
    jax.block_until_ready(out)

    ref = reference(queries, wk, wv)
    assert out.shape == (B, N, D)
    # bf16 MXU feeds + EUP approx reciprocals => slightly looser tolerance than
    # a pure-f32 path.
    assert jnp.allclose(out, ref, atol=3e-5, rtol=2e-2), \
        float(jnp.max(jnp.abs(out - ref)))

    print("KERNEL_OK")
</pallas_src>

<mosaic_0001>
module attributes {stable_mosaic.version = 11 : i64} {
  func.func @_external_attention_kernel(%arg0: i32, %arg1: i32, %arg2: i32, %arg3: memref<1x128x128xf32, #tpu.memory_space<vmem>>, %arg4: memref<128x128xbf16, #tpu.memory_space<vmem>>, %arg5: memref<128x128xbf16, #tpu.memory_space<vmem>>, %arg6: memref<1x128x128xf32, #tpu.memory_space<vmem>>, %arg7: memref<1x128xf32, #tpu.memory_space<vmem>>, %arg8: memref<1x128xf32, #tpu.memory_space<vmem>>) attributes {dimension_semantics = [#tpu.dimension_semantics<parallel>, #tpu.dimension_semantics<arbitrary>, #tpu.dimension_semantics<arbitrary>], iteration_bounds = array<i64: 2, 2, 2>, scalar_prefetch = 0 : i64, scratch_operands = 2 : i64, tpu.core_type = #tpu.core_type<tc>, window_params = [{transform_indices = @transform_0, window_bounds = array<i64: 1, 128, 128>}, {pipeline_mode = #tpu.pipeline_mode<synchronous>, transform_indices = @transform_1, window_bounds = array<i64: 128, 128>}, {pipeline_mode = #tpu.pipeline_mode<synchronous>, transform_indices = @transform_2, window_bounds = array<i64: 128, 128>}, {transform_indices = @transform_3, window_bounds = array<i64: 1, 128, 128>}]} {
    %c0 = arith.constant 0 : index
    %c0_0 = arith.constant 0 : index
    %c0_1 = arith.constant 0 : index
    %0 = vector.load %arg3[%c0, %c0_0, %c0_1] : memref<1x128x128xf32, #tpu.memory_space<vmem>>, vector<1x128x128xf32>
    %1 = vector.shape_cast %0 : vector<1x128x128xf32> to vector<128x128xf32>
    %2 = arith.truncf %1 : vector<128x128xf32> to vector<128x128xbf16>
    %c0_2 = arith.constant 0 : index
    %c0_3 = arith.constant 0 : index
    %3 = vector.load %arg4[%c0_2, %c0_3] : memref<128x128xbf16, #tpu.memory_space<vmem>>, vector<128x128xbf16>
    %cst = arith.constant dense<0.000000e+00> : vector<128x128xf32>
    %4 = tpu.matmul %2, %3, %cst {dimension_numbers = #tpu.dot_dimension_numbers<[1], [0], [0], [1], [0, 0, 1, 1], [], []>} : vector<128x128xbf16>, vector<128x128xbf16>, vector<128x128xf32> -> vector<128x128xf32>
    %c0_i32 = arith.constant 0 : i32
    %5 = arith.cmpi eq, %arg1, %c0_i32 : i32
    %6 = arith.extui %5 : i1 to i32
    %c0_i32_4 = arith.constant 0 : i32
    %7 = arith.cmpi ne, %6, %c0_i32_4 : i32
    scf.if %7 {
      %c0_i32_6 = arith.constant 0 : i32
      %11 = arith.cmpi eq, %arg2, %c0_i32_6 : i32
      %12 = arith.extui %11 : i1 to i32
      %c0_i32_7 = arith.constant 0 : i32
      %13 = arith.cmpi ne, %12, %c0_i32_7 : i32
      scf.if %13 {
        %cst_18 = arith.constant 0xFF800000 : f32
        %30 = vector.broadcast %cst_18 : f32 to vector<1x128xf32>
        %c0_19 = arith.constant 0 : index
        %c0_20 = arith.constant 0 : index
        %31 = vector.load %arg7[%c0_19, %c0_20] : memref<1x128xf32, #tpu.memory_space<vmem>>, vector<1x128xf32>
        tpu.vector_store %arg7[%c0_19, %c0_20], %30 {strides = array<i32>} : memref<1x128xf32, #tpu.memory_space<vmem>>, vector<1x128xf32>,
        %cst_21 = arith.constant 0.000000e+00 : f32
        %32 = vector.broadcast %cst_21 : f32 to vector<1x128xf32>
        %c0_22 = arith.constant 0 : index
        %c0_23 = arith.constant 0 : index
        %33 = vector.load %arg8[%c0_22, %c0_23] : memref<1x128xf32, #tpu.memory_space<vmem>>, vector<1x128xf32>
        tpu.vector_store %arg8[%c0_22, %c0_23], %32 {strides = array<i32>} : memref<1x128xf32, #tpu.memory_space<vmem>>, vector<1x128xf32>,
      } else {
      }
      %c0_8 = arith.constant 0 : index
      %c0_9 = arith.constant 0 : index
      %14 = vector.load %arg7[%c0_8, %c0_9] : memref<1x128xf32, #tpu.memory_space<vmem>>, vector<1x128xf32>
      %cst_10 = arith.constant dense<0xFF800000> : vector<128xf32>
      %15 = vector.multi_reduction <maximumf>, %4, %cst_10 [0] : vector<128x128xf32> to vector<128xf32>
      %16 = vector.shape_cast %15 : vector<128xf32> to vector<1x128xf32>
      %17 = arith.maximumf %14, %16 : vector<1x128xf32>
      %c0_11 = arith.constant 0 : index
      %c0_12 = arith.constant 0 : index
      %18 = vector.load %arg8[%c0_11, %c0_12] : memref<1x128xf32, #tpu.memory_space<vmem>>, vector<1x128xf32>
      %19 = arith.subf %14, %17 : vector<1x128xf32>
      %20 = math.exp %19 : vector<1x128xf32>
      %21 = arith.mulf %18, %20 : vector<1x128xf32>
      %22 = vector.broadcast %17 : vector<1x128xf32> to vector<128x128xf32>
      %23 = arith.subf %4, %22 : vector<128x128xf32>
      %24 = math.exp %23 : vector<128x128xf32>
      %cst_13 = arith.constant dense<0.000000e+00> : vector<128xf32>
      %25 = vector.multi_reduction <add>, %24, %cst_13 [0] : vector<128x128xf32> to vector<128xf32>
      %26 = vector.shape_cast %25 : vector<128xf32> to vector<1x128xf32>
      %27 = arith.addf %21, %26 : vector<1x128xf32>
      %c0_14 = arith.constant 0 : index
      %c0_15 = arith.constant 0 : index
      %28 = vector.load %arg8[%c0_14, %c0_15] : memref<1x128xf32, #tpu.memory_space<vmem>>, vector<1x128xf32>
      tpu.vector_store %arg8[%c0_14, %c0_15], %27 {strides = array<i32>} : memref<1x128xf32, #tpu.memory_space<vmem>>, vector<1x128xf32>,
      %c0_16 = arith.constant 0 : index
      %c0_17 = arith.constant 0 : index
      %29 = vector.load %arg7[%c0_16, %c0_17] : memref<1x128xf32, #tpu.memory_space<vmem>>, vector<1x128xf32>
      tpu.vector_store %arg7[%c0_16, %c0_17], %17 {strides = array<i32>} : memref<1x128xf32, #tpu.memory_space<vmem>>, vector<1x128xf32>,
    } else {
    }
    %c1_i32 = arith.constant 1 : i32
    %8 = arith.cmpi eq, %arg1, %c1_i32 : i32
    %9 = arith.extui %8 : i1 to i32
    %c0_i32_5 = arith.constant 0 : i32
    %10 = arith.cmpi ne, %9, %c0_i32_5 : i32
    scf.if %10 {
      %c0_6 = arith.constant 0 : index
      %c0_7 = arith.constant 0 : index
      %11 = vector.load %arg8[%c0_6, %c0_7] : memref<1x128xf32, #tpu.memory_space<vmem>>, vector<1x128xf32>
      %12 = tpu.reciprocal %11 {approx = true} : vector<1x128xf32> -> vector<1x128xf32>
      %c0_8 = arith.constant 0 : index
      %c0_9 = arith.constant 0 : index
      %13 = vector.load %arg7[%c0_8, %c0_9] : memref<1x128xf32, #tpu.memory_space<vmem>>, vector<1x128xf32>
      %14 = vector.broadcast %13 : vector<1x128xf32> to vector<128x128xf32>
      %15 = arith.subf %4, %14 : vector<128x128xf32>
      %16 = math.exp %15 : vector<128x128xf32>
      %17 = vector.broadcast %12 : vector<1x128xf32> to vector<128x128xf32>
      %18 = arith.mulf %16, %17 : vector<128x128xf32>
      %19 = tpu.iota {dimensions = array<i32: 1>} : vector<1x128xi32>
      %c64_i32 = arith.constant 64 : i32
      %20 = vector.broadcast %c64_i32 : i32 to vector<1x128xi32>
      %21 = arith.cmpi slt, %19, %20 : vector<1x128xi32>
      %cst_10 = arith.constant 0.000000e+00 : f32
      %22 = vector.shape_cast %21 : vector<1x128xi1> to vector<1x128xi1>
      %23 = vector.broadcast %22 : vector<1x128xi1> to vector<128x128xi1>
      %24 = vector.broadcast %cst_10 : f32 to vector<128x128xf32>
      %25 = arith.select %23, %18, %24 : vector<128x128xi1>, vector<128x128xf32>
      %cst_11 = arith.constant dense<0.000000e+00> : vector<128xf32>
      %26 = vector.multi_reduction <add>, %25, %cst_11 [1] : vector<128x128xf32> to vector<128xf32>
      %27 = vector.shape_cast %26 : vector<128xf32> to vector<128x1xf32>
      %28 = tpu.reciprocal %27 {approx = true} : vector<128x1xf32> -> vector<128x1xf32>
      %29 = vector.broadcast %28 : vector<128x1xf32> to vector<128x128xf32>
      %30 = arith.mulf %18, %29 : vector<128x128xf32>
      %31 = arith.truncf %30 : vector<128x128xf32> to vector<128x128xbf16>
      %c0_12 = arith.constant 0 : index
      %c0_13 = arith.constant 0 : index
      %32 = vector.load %arg5[%c0_12, %c0_13] : memref<128x128xbf16, #tpu.memory_space<vmem>>, vector<128x128xbf16>
      %cst_14 = arith.constant dense<0.000000e+00> : vector<128x128xf32>
      %33 = tpu.matmul %31, %32, %cst_14 {dimension_numbers = #tpu.dot_dimension_numbers<[1], [0], [0], [1], [0, 0, 1, 1], [], []>} : vector<128x128xbf16>, vector<128x128xbf16>, vector<128x128xf32> -> vector<128x128xf32>
      %c0_15 = arith.constant 0 : index
      %c0_16 = arith.constant 0 : index
      %c0_17 = arith.constant 0 : index
      %34 = vector.load %arg6[%c0_15, %c0_16, %c0_17] : memref<1x128x128xf32, #tpu.memory_space<vmem>>, vector<1x128x128xf32>
      %35 = vector.shape_cast %34 : vector<1x128x128xf32> to vector<128x128xf32>
      %36 = vector.shape_cast %33 : vector<128x128xf32> to vector<1x128x128xf32>
      tpu.vector_store %arg6[%c0_15, %c0_16, %c0_17], %36 {strides = array<i32>} : memref<1x128x128xf32, #tpu.memory_space<vmem>>, vector<1x128x128xf32>,
    } else {
    }
    return
  }
  func.func @transform_0(%arg0: i32, %arg1: i32, %arg2: i32) -> (i32, i32, i32) {
    %c0_i32 = arith.constant 0 : i32
    %c0_i32_0 = arith.constant 0 : i32
    return %arg0, %arg2, %c0_i32 : i32, i32, i32
  }
  func.func @transform_1(%arg0: i32, %arg1: i32, %arg2: i32) -> (i32, i32) {
    %c0_i32 = arith.constant 0 : i32
    %c0_i32_0 = arith.constant 0 : i32
    %c0_i32_1 = arith.constant 0 : i32
    return %c0_i32, %c0_i32_0 : i32, i32
  }
  func.func @transform_2(%arg0: i32, %arg1: i32, %arg2: i32) -> (i32, i32) {
    %c0_i32 = arith.constant 0 : i32
    %c0_i32_0 = arith.constant 0 : i32
    %c0_i32_1 = arith.constant 0 : i32
    return %c0_i32, %c0_i32_0 : i32, i32
  }
  func.func @transform_3(%arg0: i32, %arg1: i32, %arg2: i32) -> (i32, i32, i32) {
    %0 = arith.muli %arg2, %arg1 : i32
    %c0_i32 = arith.constant 0 : i32
    %c0_i32_0 = arith.constant 0 : i32
    return %arg0, %0, %c0_i32 : i32, i32, i32
  }
}

</mosaic_0001>

<bundles_post_ra>
// kernel: tpu_custom_call.1
= control target key start
LH: loop header
LB: loop body
LE: loop exit
PB: predicated region body
PF: predicated region fallthrough
CT: control target
= control target key end

     0   :  { %s2261_s0 = inlined_call_operand.hbm [shape: f32[2,256,128], index: 0, kind: input, shape index: {}]   ;;  %s2262_s1 = inlined_call_operand.hbm [shape: bf16[128,128], index: 1, kind: input, shape index: {}]   ;;  %s2263_s2 = inlined_call_operand.hbm [shape: bf16[128,128], index: 2, kind: input, shape index: {}]   ;;  %s2264_s3 = inlined_call_operand.hbm [shape: f32[2,256,128], index: 3, kind: output, shape index: {}]  }
   0x1   :  { %2279 = sst [smem:[#allocation25_spill]] %s2262_s1 }
   0x2   :  { %2280 = sst [smem:[#allocation26_spill]] %s2263_s2 }
   0x3   :  { %2281 = sst [smem:[#allocation27_spill]] %s2264_s3 }
   0x4   :  { %8 = vsyncpa [#allocation5], 0 }
   0x5   :  { %10 = vsyncpa [#allocation5 + $0x1], 0 }
   0x6   :  { %11 = vsyncpa [#allocation8], 0 }
   0x7   :  { %12 = vsyncpa [#allocation6], 0 }
   0x8   :  { %14 = vsyncpa [#allocation6 + $0x1], 0  ;;  %s1721_s12 = smov 0   ;;  %s1723_s13 = smov 0  }
   0x9   :  { %s1725_s14 = smov 0   ;;  %s1727_s15 = smov 0  }
   0xa   :  { %s1729_s16 = smov 0   ;;  %s1731_s17 = smov 0  }
   0xb   :  { %s1733_s18 = smov 0   ;;  %s1735_s19 = smov 0  }
   0xc   :  { %s1737_s20 = smov 0   ;;  %s1739_s21 = smov 0  }
   0xd   :  { %s1741_s22 = smov 0   ;;  %s1743_s23 = smov 0  }
   0xe   :  { %s1745_s24 = smov 0  }
   0xf LB: > { %2282 = sst [smem:[#allocation14_spill]] %s1639_s12  ;;  %s1035_s25 = sadd.s32 4294967295, %s1687_s24   ;;  %s1687_s24 = sphi %s1745_s24, %s20_s24   ;;  %s1683_s23 = sphi %s1743_s23, %s2331_s23   ;;  %s1679_s22 = sphi %s1741_s22, %s2324_s22   ;;  %s1675_s21 = sphi %s1739_s21, %s2323_s21   ;;  %s1671_s20 = sphi %s1737_s20, %s2330_s20   ;;  %s1667_s19 = sphi %s1735_s19, %s2322_s19   ;;  %s1663_s18 = sphi %s1733_s18, %s2321_s18   ;;  %s1659_s17 = sphi %s1731_s17, %s2329_s17   ;;  %s1655_s16 = sphi %s1729_s16, %s2328_s16   ;;  %s1651_s15 = sphi %s1727_s15, %s2327_s15   ;;  %s1647_s14 = sphi %s1725_s14, %s2326_s14   ;;  %s1643_s13 = sphi %s1723_s13, %s2325_s13   ;;  %s1639_s12 = sphi %s1721_s12, %s2320_s12  }
  0x10   : > { %2283 = sst [smem:[#allocation15_spill]] %s1643_s13  ;;  %s1036_s26 = sadd.s32 4294967294, %s1687_s24  }
  0x11   : > { %2284 = sst [smem:[#allocation16_spill]] %s1663_s18  ;;  %p61_p0 = scmp.ne.s32.totalorder %s1655_s16, %s1651_s15 }
  0x12   : > { %2285 = sst [smem:[#allocation17_spill]] %s1667_s19  ;;  %p1787_p1 = scmp.eq.s32.totalorder %s1035_s25, 0 }
  0x13   : > { %2286 = sst [smem:[#allocation18_spill]] %s1671_s20  ;;  %p130_p2 = scmp.ne.s32.totalorder %s1647_s14, %s1643_s13 }
  0x14   : > { %2287 = sst [smem:[#allocation19_spill]] %s1675_s21  ;;  %p1796_p3 = por %p1787_p1, %p61_p0 }
  0x15   : > { %2288 = sst [smem:[#allocation20_spill]] %s1679_s22  ;;  %p131_p4 = scmp.eq.s32.totalorder %s1035_s25, 7 }
  0x16   : > { %s2289_s27 = scalar_select %p1787_p1, 1, 0 }
  0x17   : > { %p136_p5 = scmp.ne.s32.totalorder %s1643_s13, %s1639_s12  ;;  %p137_p6 = scmp.eq.s32.totalorder %s1036_s26, 7 }
  0x18   : > { %p1802_p7 = por %p131_p4, %p130_p2  ;;  %p1037_p8 = scmp.ge.s32.totalorder %s1687_s24, 1 }
  0x19   : > { %p1807_p9 = por %p137_p6, %p136_p5  ;;  %p144_p10 = scmp.lt.s32.totalorder %s1687_s24, 9 }
  0x1a   : > { %s2291_s30 = scalar_select %p1802_p7, 1, 0 }
  0x1b   : > { %s2293_s4 = scalar_select %p1807_p9, 1, 0 }
  0x1c   : > { %2292 = sst [smem:[#allocation21_spill]] %s2291_s30  ;;  %p1812_p11 = pnand %p1037_p8, %p144_p10 }
  0x1d   : > { %2294 = sst [smem:[#allocation22_spill]] %s2293_s4  ;;  %s1689_s6 = smov [#allocation7]  }
  0x1e   : > { %s156_s7 = sshll.u32 %s1689_s6, 4  ;;  %p1216_p12 = pneg %p1812_p11  ;;  %s157_s7 = int_to_ptr.vmem [resolvable:$true] %s156_s7 }
  0x1f   : > { %s1690_s9 = smov [#allocation9]   ;;  %s1478_s11 = scalar_lea.vmem %s157_s7, 1024 }
  0x20   : > { %p1820_p13 = pnand %p1216_p12, %p1787_p1  ;;  %s169_s10 = sshll.u32 %s1690_s9, 4  ;;  %s170_s10 = int_to_ptr.vmem [resolvable:$true] %s169_s10 }
  0x21   : > { %p1479_p2 = scmp.ne.s32.totalorder %s157_s7, %s1478_s11  ;;  %p1486_p6 = scmp.lt.s32.totalorder %s157_s7, %s157_s7 }
  0x22   : > { %p1469_p0 = pneg %p1820_p13  ;;  %p1487_p8 = scmp.lt.s32.totalorder %s1478_s11, %s1478_s11 }
  0x24   : > { %p1481_p4 = pnand %p1479_p2, %p1469_p0  ;;  %p1488_p10 = por %p1487_p8, %p1486_p6 }
  0x26   : > { %p1482_p5 = pneg %p1481_p4 }
  0x28   : > { %p1489_p12 = pnand %p1488_p10, %p1482_p5 }
  0x2a   : > { %1492 = shalt.err (!%p1489_p12)
}
  0x2b   : > { %s1691_s15 = smov 64   ;;  %s1692_s25 = smov 4  }
  0x2c   : > { %s2297_s1 = sld [smem:[#allocation25_spill]]  ;;  %s1504_s9 = scalar_lea.vmem %s170_s10, 1024 }
  0x2d   : > { %p1505_p9 = scmp.ne.s32.totalorder %s170_s10, %s1504_s9  ;;  %p1512_p7 = scmp.lt.s32.totalorder %s170_s10, %s170_s10 }
  0x2e   : > { %p1513_p1 = scmp.lt.s32.totalorder %s1504_s9, %s1504_s9 }
  0x2f   : > { %p1507_p2 = pnand %p1505_p9, %p1469_p0 }
  0x30   : > { %p1514_p6 = por %p1513_p1, %p1512_p7 }
  0x31   : > { %p1508_p4 = pneg %p1507_p2 }
  0x32   : > { %1219 = dma.hbm_to_vmem [thread:$0]  (!%p1820_p13), %s2297_s1, 1024, %s157_s7, [#allocation8], %s1691_s15, %s1691_s15, %s1692_s25  }
  0x33   : > { %p1515_p5 = pnand %p1514_p6, %p1508_p4 }
  0x35   : > { %1518 = shalt.err (!%p1515_p5)
}
  0x36   : > { %s2298_s2 = sld [smem:[#allocation26_spill]]  ;;  %s32_s7 = sadd.s32 1, %s1675_s21 }
  0x37   : > { %s35_s26 = sadd.s32 1, %s1679_s22  ;;  %p33_p1 = scmp.ge.s32.totalorder %s32_s7, 2 }
  0x38   : > { %s39_s8 = sadd.s32 1, %s1683_s23  ;;  %s48_s28 = sadd.s32 1, %s1659_s17 }
  0x39   : > { %p55_p7 = scmp.ne.s32.totalorder %s1659_s17, %s1655_s16  ;;  %s2333_s7 = smov (%p33_p1, %s32_s7), 0 }
  0x3a   : > { %2299 = sst [smem:[#allocation23_spill]] %s2333_s7  ;;  %s2335_s26 = smov (!%p33_p1, %s35_s26), %s1679_s22 }
  0x3b   : > { %s44_s6 = ssub.s32 %s1675_s21, %s2333_s7  ;;  %p56_p9 = scmp.eq.s32.totalorder %s1687_s24, 0 }
  0x3c   : > { %1222 = dma.hbm_to_vmem [thread:$0]  (!%p1820_p13), %s2298_s2, 1024, %s170_s10, [#allocation8], %s1691_s15, %s1691_s15, %s1692_s25  }
  0x3d   : > { %p37_p0 = scmp.ge.s32.totalorder %s2335_s26, 2  ;;  %s113_s10 = smul.u32 %s1675_s21, %s1679_s22 }
  0x3e   : > { %p1856_p13 = por %p56_p9, %p55_p7  ;;  %p1233_p8 = scmp.lt.s32.totalorder %s1687_s24, 8 }
  0x3f   : > { %s2337_s26 = smov (%p37_p0, %s2335_s26), 0  ;;  %s2339_s8 = smov (!%p37_p0, %s39_s8), %s1683_s23 }
  0x40   : > { %2301 = sst [smem:[#allocation24_spill]] %s2337_s26  ;;  %s114_s25 = smul.u32 %s2337_s26, %s2333_s7 }
  0x41   : > { %s183_s9 = sand.u32 1, %s1659_s17   ;;  %p41_p10 = scmp.ge.s32.totalorder %s2339_s8, 2 }
  0x42   : > { %s116_s11 = ssub.s32 %s113_s10, %s114_s25  ;;  %s1041_s1 = sshll.u32 %s183_s9, 7 }
  0x43   : > { %s2341_s8 = smov (%p41_p10, %s2339_s8), 0  ;;  %s1042_s2 = sshll.u32 %s1675_s21, 4 }
  0x44   : > { %s43_s22 = ssub.s32 %s1683_s23, %s2341_s8  ;;  %s1043_s4 = sshll.u32 %s1683_s23, 5 }
  0x45   : > { %s45_s12 = sor.u32 %s44_s6, %s43_s22  ;;  %s117_s3 = sor.u32 %s116_s11, %s43_s22 }
  0x46   : > { %p46_p12 = scmp.eq.s32.totalorder %s45_s12, 0  ;;  %p118_p2 = scmp.eq.s32.totalorder %s117_s3, 0 }
  0x47   : > { %s193_s26 = sadd.s32 %s1043_s4, %s1042_s2  ;;  %s187_s7 = scalar_lea.vmem [#allocation4], %s1041_s1 }
  0x48   : > { %s196_s30 = sshll.u32 %s187_s7, 4  ;;  %s2302_s18 = sadd.s32 1, %s1647_s14  ;;  %s197_s30 = int_to_ptr.vmem [resolvable:$true] %s196_s30 }
  0x49   : > { %s1874_s20 = scalar_select %p46_p12, %s1659_s17, %s48_s28  }
  0x4a   : > { %s1879_s10 = scalar_select %p118_p2, %s1647_s14, %s2302_s18  }
  0x4b   : > { %s1044_s25 = sshll.u32 %s193_s26, 7  ;;  %p1888_p4 = pnand %p1233_p8, %p1856_p13 }
  0x4c   : > { %s195_s21 = scalar_lea.hbm %s2261_s0, %s1044_s25  ;;  %s184_s1 = scalar_lea.sflag [#allocation5], %s183_s9 }
  0x4d   : > { %p1521_p6 = pneg %p1888_p4  ;;  %s1532_s2 = scalar_lea.vmem %s197_s30, 2048 }
  0x4e   : > { %p1533_p5 = scmp.ne.s32.totalorder %s197_s30, %s1532_s2  ;;  %s1693_s3 = smov [#allocation4]  }
  0x4f   : > { %s1537_s12 = sshll.u32 %s1693_s3, 4  ;;  %s1538_s12 = int_to_ptr.vmem [resolvable:$false] %s1537_s12 }
  0x50   : > { %p1535_p1 = pnand %p1533_p5, %p1521_p6  ;;  %s1539_s18 = scalar_lea.vmem %s1538_s12, 4096 }
  0x51   : > { %p1540_p9 = scmp.lt.s32.totalorder %s197_s30, %s1538_s12  ;;  %p1541_p0 = scmp.lt.s32.totalorder %s1539_s18, %s1532_s2 }
  0x52   : > { %p1536_p7 = pneg %p1535_p1 }
  0x53   : > { %p1542_p10 = por %p1541_p0, %p1540_p9 }
  0x55   : > { %p1543_p12 = pnand %p1542_p10, %p1536_p7 }
  0x57   : > { %1546 = shalt.err (!%p1543_p12)
}
  0x58   : > { %s1694_s13 = smov 128   ;;  %s1695_s19 = smov 8  }
  0x59   : > { %1226 = dma.hbm_to_vmem [thread:$0]  (!%p1888_p4), %s195_s21, 2048, %s197_s30, %s184_s1, %s1694_s13, %s1694_s13, %s1695_s19  }
  0x5a   : > { %208 = sbr.rel (%p1812_p11) target bundleno = 886 (0x376), region = 32  ;;  %s210_s4 = sand.u32 (!%p1812_p11), 1, %s1655_s16  }
  0x5b   : > { %s1046_s7 = sshll.u32 (!%p1812_p11), %s210_s4, 7  ;;  %s211_s26 = scalar_lea.sflag (!%p1812_p11), [#allocation5], %s210_s4 }
  0x5c   : > { %s1899_s28 = scalar_lea.vmem (!%p1812_p11), [#allocation4], %s1046_s7 }
  0x5f   : > { %1626 = dma.done.wait (%p1796_p3), %s211_s26, 2048  }
  0x60   : > { %1628 = vsyncadd (%p1796_p3), %s211_s26, 4294965248  ;;  %p2304_p13 = scmp.ne.s32.totalorder %s2289_s27, 0 }
  0x62   : > { %1630 = dma.done.wait (%p2304_p13), [#allocation8], 2048  }
  0x63   : > { %1632 = vsyncadd (%p2304_p13), [#allocation8], 4294965248  ;;  %s2305_s21 = sld [smem:[#allocation15_spill]]  ;;  %v1351_v0 = vld [vmem:[#allocation7 + $0x38] sm:$0xff]   ;;  %v1352_v1 = vld [vmem:[#allocation7 + $0x30] sm:$0xff]  }
  0x64   : > { %1108 = vmatprep.subr.bf16.mxu0 %v1351_v0  ;;  %1172 = vmatprep.subr.bf16.mxu1 %v1351_v0  ;;  %v1353_v2 = vld [vmem:[#allocation7 + $0x28] sm:$0xff]   ;;  %v1354_v3 = vld [vmem:[#allocation7 + $0x20] sm:$0xff]   ;;  %v1355_v10 = vld [vmem:[#allocation7 + $0x18] sm:$0xff]   ;;  %s2306_s29 = sld [smem:[#allocation17_spill]] }
  0x65   : > { %1109 = vmatpush3.bf16.msra.mxu0 %v1351_v0  ;;  %1180 = vmatpush3.bf16.msra.mxu1 %v1351_v0  ;;  %v249_v4 = vld [vmem:[%s1899_s28] sm:$0xff]  ;;  %v250_v5 = vld [vmem:[%s1899_s28 + $0x8] sm:$0xff]  ;;  %v1356_v11 = vld [vmem:[#allocation7 + $0x10] sm:$0xff]  }
  0x66   : > { %1110 = vmatprep.subr.bf16.mxu0 %v1352_v1  ;;  %1173 = vmatprep.subr.bf16.mxu1 %v1352_v1  ;;  %v257_v6 = vld [vmem:[%s1899_s28 + $0x40] sm:$0xff]  ;;  %v265_v7 = vpack.c.bf16 %v250_v5, %v249_v4  ;;  %v258_v8 = vld [vmem:[%s1899_s28 + $0x48] sm:$0xff]  ;;  %v251_v14 = vld [vmem:[%s1899_s28 + $0x10] sm:$0xff] }
  0x67   : > { %v269_v9 = vpack.c.bf16 %v258_v8, %v257_v6  ;;  %v1357_v12 = vld [vmem:[#allocation7 + $0x8] sm:$0xff]   ;;  %v1358_v13 = vld [vmem:[#allocation7] sm:$0xff]   ;;  %v252_v15 = vld [vmem:[%s1899_s28 + $0x18] sm:$0xff] }
  0x68   : > { %1124 = vmatprep.mubr.bf16.mxu0 %v265_v7  ;;  %v259_v16 = vld [vmem:[%s1899_s28 + $0x50] sm:$0xff]  ;;  %v260_v17 = vld [vmem:[%s1899_s28 + $0x58] sm:$0xff]  ;;  %v253_v18 = vld [vmem:[%s1899_s28 + $0x20] sm:$0xff]  ;;  %v266_v22 = vpack.c.bf16 %v252_v15, %v251_v14 }
  0x69   : > { %s242_s30 = sand.u32 1, %s2305_s21   ;;  %1111 = vmatpush3.bf16.msra.mxu0 %v1352_v1  ;;  %1181 = vmatpush3.bf16.msra.mxu1 %v1352_v1  ;;  %v254_v19 = vld [vmem:[%s1899_s28 + $0x28] sm:$0xff]  ;;  %v261_v20 = vld [vmem:[%s1899_s28 + $0x60] sm:$0xff]  ;;  %v270_v23 = vpack.c.bf16 %v260_v17, %v259_v16  ;;  %v255_v26 = vld [vmem:[%s1899_s28 + $0x30] sm:$0xff] }
  0x6a   : > { %s1912_s5 = sshll.u32 %s242_s30, 7  ;;  %1112 = vmatprep.subr.bf16.mxu0 %v1353_v2  ;;  %1174 = vmatprep.subr.bf16.mxu1 %v1353_v2  ;;  %v262_v21 = vld [vmem:[%s1899_s28 + $0x68] sm:$0xff]  ;;  %v267_v24 = vpack.c.bf16 %v254_v19, %v253_v18  ;;  %v256_v27 = vld [vmem:[%s1899_s28 + $0x38] sm:$0xff]  ;;  %v263_v28 = vld [vmem:[%s1899_s28 + $0x70] sm:$0xff]  ;;  %p1058_p3 = scmp.ne.s32.totalorder %s2306_s29, 0 }
  0x6b   : > { %1132 = vmatprep.mubr.bf16.mxu1 %v269_v9  ;;  %v271_v25 = vpack.c.bf16 %v262_v21, %v261_v20  ;;  %v264_v29 = vld [vmem:[%s1899_s28 + $0x78] sm:$0xff]  ;;  %v268_v30 = vpack.c.bf16 %v256_v27, %v255_v26  ;;  %s1963_s27 = scalar_lea.vmem [#allocation10], %s1912_s5  ;;  %s2307_s6 = sld [smem:[#allocation16_spill]] (!%p1058_p3) }
  0x6c   : > { %v272_v31 = vpack.c.bf16 %v264_v29, %v263_v28 }
  0x6d   : > { %1113 = vmatpush3.bf16.msra.mxu0 %v1353_v2  ;;  %1182 = vmatpush3.bf16.msra.mxu1 %v1353_v2 }
  0x6e   : > { %1114 = vmatprep.subr.bf16.mxu0 %v1354_v3  ;;  %1175 = vmatprep.subr.bf16.mxu1 %v1354_v3 }
  0x71   : > { %1115 = vmatpush3.bf16.msra.mxu0 %v1354_v3  ;;  %1183 = vmatpush3.bf16.msra.mxu1 %v1354_v3  ;;  %p1059_p11 = scmp.ne.s32.totalorder (!%p1058_p3), %s2307_s6, 0 }
  0x72   : > { %1116 = vmatprep.subr.bf16.mxu0 %v1355_v10  ;;  %1176 = vmatprep.subr.bf16.mxu1 %v1355_v10 }
  0x75   : > { %1117 = vmatpush3.bf16.msra.mxu0 %v1355_v10  ;;  %1184 = vmatpush3.bf16.msra.mxu1 %v1355_v10 }
  0x76   : > { %1118 = vmatprep.subr.bf16.mxu0 %v1356_v11  ;;  %1177 = vmatprep.subr.bf16.mxu1 %v1356_v11 }
  0x79   : > { %1119 = vmatpush3.bf16.msra.mxu0 %v1356_v11  ;;  %1185 = vmatpush3.bf16.msra.mxu1 %v1356_v11 }
  0x7a   : > { %1120 = vmatprep.subr.bf16.mxu0 %v1357_v12  ;;  %1178 = vmatprep.subr.bf16.mxu1 %v1357_v12 }
  0x7d   : > { %1121 = vmatpush3.bf16.msra.mxu0 %v1357_v12  ;;  %1186 = vmatpush3.bf16.msra.mxu1 %v1357_v12 }
  0x7e   : > { %1122 = vmatprep.subr.bf16.mxu0 %v1358_v13  ;;  %1179 = vmatprep.subr.bf16.mxu1 %v1358_v13 }
  0x81   : > { %1123 = vmatpush3.bf16.msra.mxu0 %v1358_v13  ;;  %1187 = vmatpush3.bf16.msra.mxu1 %v1358_v13 }
  0x84   : > { %1125 = vmatmul.mubr.bf16.vlgmr.msra.gmra.mxu0 %v266_v22  ;;  %1133 = vmatmul.mubr.bf16.vlgmr.msra.gmra.mxu1 %v270_v23 }
  0x85   : > { %1128 = vmatprep.mubr.bf16.mxu0 %v267_v24  ;;  %1136 = vmatprep.mubr.bf16.mxu1 %v271_v25 }
  0x8c   : > { %1129 = vmatmul.mubr.bf16.gmra.mxu0 %v268_v30  ;;  %1137 = vmatmul.mubr.bf16.gmra.mxu1 %v272_v31 }
 0x144   : > { %v1930_v32 = vpop.f32.mrf.mxu0  ;;  %v1932_v33 = vpop.f32.mrf.mxu1 }
 0x146   : > { %v1934_v34 = vpop.f32.mrf.mxu0  ;;  %v1936_v35 = vpop.f32.mrf.mxu1 }
 0x148   : > { %v1938_v36 = vpop.f32.mrf.mxu0  ;;  %v1940_v37 = vpop.f32.mrf.mxu1 }
 0x14a   : > { %v1942_v38 = vpop.f32.mrf.mxu0  ;;  %v1944_v39 = vpop.f32.mrf.mxu1 }
 0x14c   : > { %v1946_v40 = vpop.f32.mrf.mxu0  ;;  %v1948_v41 = vpop.f32.mrf.mxu1 }
 0x14e   : > { %v1950_v42 = vpop.f32.mrf.mxu0  ;;  %v1952_v43 = vpop.f32.mrf.mxu1  ;;  %437 = sbr.rel (%p1058_p3) target bundleno = 436 (0x1b4), region = 48 }
 0x150   : > { %v1954_v44 = vpop.f32.mrf.mxu0  ;;  %v1956_v45 = vpop.f32.mrf.mxu1 }
 0x152   : > { %v1958_v46 = vpop.f32.mrf.mxu0  ;;  %v1960_v47 = vpop.f32.mrf.mxu1 }
 0x153   : > { %441 = sbr.rel (%p1059_p11) target bundleno = 346 (0x15a), region = 52 }
 0x158   : > { %v1696_v48 = vmov -inf   ;;  %v1697_v49 = vmov 0.0  }
 0x159   : > { %442 = vst [vmem:[#allocation2] sm:$0x1] %v1696_v48  ;;  %443 = vst [vmem:[#allocation3] sm:$0x1] %v1697_v49 }
 0x15a PF: > { %v445_v50 = vmax.f32 %v1934_v34, %v1950_v42  ;;  %v446_v51 = vmax.f32 %v1942_v38, %v1958_v46  ;;  %v447_v52 = vmax.f32 %v1930_v32, %v1946_v40  ;;  %v448_v53 = vmax.f32 %v1938_v36, %v1954_v44 }
 0x15b   : > { %v473_v3 = vlaneseq }
 0x15c   : > { %v449_v54 = vmax.f32 %v445_v50, %v1936_v35  ;;  %v450_v55 = vmax.f32 %v446_v51, %v1944_v39  ;;  %v451_v56 = vmax.f32 %v447_v52, %v1932_v33  ;;  %v452_v57 = vmax.f32 %v448_v53, %v1940_v37 }
 0x15d   : > { %v474_v6 = vshrl.u32 %v473_v3, 7 }
 0x15e   : > { %v453_v58 = vmax.f32 %v449_v54, %v1952_v43  ;;  %v454_v59 = vmax.f32 %v450_v55, %v1960_v47  ;;  %v455_v60 = vmax.f32 %v451_v56, %v1948_v41  ;;  %v456_v61 = vmax.f32 %v452_v57, %v1956_v45 }
 0x15f   : > { %v475_v10 = vsub.s32 0, %v474_v6 }
 0x160   : > { %v457_v62 = vmax.f32 %v453_v58, %v454_v59  ;;  %v458_v63 = vmax.f32 %v455_v60, %v456_v61  ;;  %v1983_v8 = vld [vmem:[#allocation2] sm:$0x1] }
 0x162   : > { %v459_v0 = vmax.f32 %v457_v62, %v458_v63 }
 0x164   : > { %v460_v1 = vrot.slane %v459_v0, 4 }
 0x166   : > { %v461_v2 = vmax.f32 %v459_v0, %v460_v1 }
 0x168   : > { %v462_v4 = vrot.slane %v461_v2, 2 }
 0x16a   : > { %v463_v5 = vmax.f32 %v461_v2, %v462_v4 }
 0x16c   : > { %v464_v7 = vrot.slane %v463_v5, 1 }
 0x16e   : > { %v465_v9 = vmax.f32 %v463_v5, %v464_v7 }
 0x170   : > { %v1986_v11 = vmax.f32 %v1983_v8, %v465_v9 }
 0x172   : > { %v476_v12 = vrot.slane %v1986_v11, %v475_v10  ;;  %549 = vst [vmem:[#allocation2] sm:$0x1] %v1986_v11 }
 0x174   : > { %v478_v13 = vsub.f32 %v1934_v34, %v476_v12  ;;  %v479_v14 = vsub.f32 %v1942_v38, %v476_v12  ;;  %v480_v15 = vsub.f32 %v1930_v32, %v476_v12  ;;  %v481_v16 = vsub.f32 %v1938_v36, %v476_v12 }
 0x175   : > { %v482_v17 = vsub.f32 %v1950_v42, %v476_v12  ;;  %v483_v20 = vsub.f32 %v1958_v46, %v476_v12  ;;  %v484_v23 = vsub.f32 %v1946_v40, %v476_v12  ;;  %v485_v25 = vsub.f32 %v1954_v44, %v476_v12 }
 0x176   : > { %v494_v18 = vmul.f32 1.442695, %v478_v13  ;;  %v496_v19 = vmul.f32 1.442695, %v479_v14  ;;  %v498_v21 = vmul.f32 1.442695, %v480_v15  ;;  %v486_v27 = vsub.f32 %v1936_v35, %v476_v12 }
 0x177   : > { %v500_v22 = vmul.f32 1.442695, %v481_v16  ;;  %v502_v24 = vmul.f32 1.442695, %v482_v17  ;;  %v504_v26 = vmul.f32 1.442695, %v483_v20  ;;  %v487_v29 = vsub.f32 %v1944_v39, %v476_v12 }
 0x178   : > { %1359 = vpow2.f32 %v494_v18  ;;  %v506_v28 = vmul.f32 1.442695, %v484_v23  ;;  %v508_v30 = vmul.f32 1.442695, %v485_v25  ;;  %v488_v31 = vsub.f32 %v1932_v33, %v476_v12 }
 0x179   : > { %1361 = vpow2.f32 %v496_v19  ;;  %v510_v48 = vmul.f32 1.442695, %v486_v27  ;;  %v489_v49 = vsub.f32 %v1940_v37, %v476_v12  ;;  %v512_v50 = vmul.f32 1.442695, %v487_v29 }
 0x17a   : > { %1363 = vpow2.f32 %v498_v21  ;;  %v490_v52 = vsub.f32 %v1952_v43, %v476_v12  ;;  %v514_v53 = vmul.f32 1.442695, %v488_v31  ;;  %v491_v56 = vsub.f32 %v1960_v47, %v476_v12 }
 0x17b   : > { %1365 = vpow2.f32 %v500_v22  ;;  %v516_v57 = vmul.f32 1.442695, %v489_v49  ;;  %v492_v60 = vsub.f32 %v1948_v41, %v476_v12  ;;  %v493_v0 = vsub.f32 %v1956_v45, %v476_v12 }
 0x17c   : > { %1367 = vpow2.f32 %v502_v24  ;;  %v518_v61 = vmul.f32 1.442695, %v490_v52  ;;  %v520_v1 = vmul.f32 1.442695, %v491_v56  ;;  %v468_v12 = vsub.f32 %v1983_v8, %v1986_v11  ;;  %v467_v11 = vld [vmem:[#allocation3] sm:$0x1] }
 0x17d   : > { %1369 = vpow2.f32 %v504_v26  ;;  %v522_v4 = vmul.f32 1.442695, %v492_v60  ;;  %v524_v7 = vmul.f32 1.442695, %v493_v0 }
 0x17e   : > { %1371 = vpow2.f32 %v506_v28  ;;  %v469_v21 = vmul.f32 1.442695, %v468_v12 }
 0x17f   : > { %1373 = vpow2.f32 %v508_v30 }
 0x180   : > { %1375 = vpow2.f32 %v510_v48 }
 0x181   : > { %1377 = vpow2.f32 %v512_v50 }
 0x182   : > { %1379 = vpow2.f32 %v514_v53 }
 0x183   : > { %1381 = vpow2.f32 %v516_v57 }
 0x184   : > { %1383 = vpow2.f32 %v518_v61 }
 0x185   : > { %v1360_v51 = vpop.eup %1359  ;;  %1385 = vpow2.f32 %v520_v1 }
 0x186   : > { %v1362_v54 = vpop.eup %1361  ;;  %1387 = vpow2.f32 %v522_v4 }
 0x187   : > { %v1364_v55 = vpop.eup %1363  ;;  %v526_v58 = vadd.f32 %v1362_v54, %v1360_v51  ;;  %1389 = vpow2.f32 %v524_v7 }
 0x188   : > { %v1366_v59 = vpop.eup %1365  ;;  %1391 = vpow2.f32 %v469_v21 }
 0x189   : > { %v527_v62 = vadd.f32 %v1364_v55, %v526_v58  ;;  %v1368_v63 = vpop.eup %1367 }
 0x18a   : > { %v1370_v3 = vpop.eup %1369 }
 0x18b   : > { %v528_v2 = vadd.f32 %v1366_v59, %v527_v62  ;;  %v1372_v6 = vpop.eup %1371 }
 0x18c   : > { %v1374_v10 = vpop.eup %1373 }
 0x18d   : > { %v529_v5 = vadd.f32 %v1368_v63, %v528_v2  ;;  %v1376_v14 = vpop.eup %1375 }
 0x18e   : > { %v1378_v16 = vpop.eup %1377 }
 0x18f   : > { %v530_v9 = vadd.f32 %v1370_v3, %v529_v5  ;;  %v1380_v18 = vpop.eup %1379 }
 0x190   : > { %v1382_v20 = vpop.eup %1381 }
 0x191   : > { %v531_v13 = vadd.f32 %v1372_v6, %v530_v9  ;;  %v1384_v23 = vpop.eup %1383 }
 0x192   : > { %v1386_v25 = vpop.eup %1385 }
 0x193   : > { %v532_v15 = vadd.f32 %v1374_v10, %v531_v13  ;;  %v1388_v27 = vpop.eup %1387 }
 0x194   : > { %v1390_v29 = vpop.eup %1389 }
 0x195   : > { %v533_v17 = vadd.f32 %v1376_v14, %v532_v15  ;;  %v1392_v8 = vpop.eup %1391 }
 0x196   : > { %v471_v52 = vmul.f32 %v1392_v8, %v467_v11 }
 0x197   : > { %v534_v19 = vadd.f32 %v1378_v16, %v533_v17 }
 0x199   : > { %v535_v22 = vadd.f32 %v1380_v18, %v534_v19 }
 0x19b   : > { %v536_v24 = vadd.f32 %v1382_v20, %v535_v22 }
 0x19d   : > { %v537_v26 = vadd.f32 %v1384_v23, %v536_v24 }
 0x19f   : > { %v538_v28 = vadd.f32 %v1386_v25, %v537_v26 }
 0x1a1   : > { %v539_v30 = vadd.f32 %v1388_v27, %v538_v28 }
 0x1a3   : > { %v540_v31 = vadd.f32 %v1390_v29, %v539_v30 }
 0x1a5   : > { %v541_v48 = vrot.slane %v540_v31, 4 }
 0x1a7   : > { %v542_v49 = vadd.f32 %v541_v48, %v540_v31 }
 0x1a9   : > { %v543_v50 = vrot.slane %v542_v49, 2 }
 0x1ab   : > { %v544_v51 = vadd.f32 %v543_v50, %v542_v49 }
 0x1ad   : > { %v545_v53 = vrot.slane %v544_v51, 1 }
 0x1af   : > { %v546_v54 = vadd.f32 %v545_v53, %v544_v51 }
 0x1b1   : > { %v547_v55 = vadd.f32 %v546_v54, %v471_v52 }
 0x1b3   : > { %548 = vst [vmem:[#allocation3] sm:$0x1] %v547_v55 }
 0x1b4 PF: > { %s2308_s15 = sld [smem:[#allocation17_spill]] }
 0x1ba   : > { %p1060_p8 = scmp.ne.s32.totalorder %s2308_s15, 1 }
 0x1bc   : > { %553 = sbr.rel (%p1060_p8) target bundleno = 856 (0x358), region = 56 }
 0x1c1   : > { %v554_v56 = vld [vmem:[#allocation3] sm:$0x1]  ;;  %v2009_v57 = vld [vmem:[#allocation2] ss:$0 sm:$0xff]  ;;  %v612_v62 = vlaneseq  ;;  %v1394_v1 = vld [vmem:[#allocation9 + $0x30] sm:$0xff]  }
 0x1c2   : > { %1401 = vrcp.f32 %v554_v56  ;;  %v571_v58 = vsub.f32 %v1936_v35, %v2009_v57  ;;  %v563_v59 = vsub.f32 %v1934_v34, %v2009_v57  ;;  %v572_v60 = vsub.f32 %v1944_v39, %v2009_v57  ;;  %v1393_v61 = vld [vmem:[#allocation9 + $0x38] sm:$0xff]  }
 0x1c3   : > { %v564_v63 = vsub.f32 %v1942_v38, %v2009_v57  ;;  %v566_v0 = vsub.f32 %v1938_v36, %v2009_v57  ;;  %v565_v35 = vsub.f32 %v1930_v32, %v2009_v57  ;;  %1140 = vmatprep.subr.bf16.mxu0 %v1393_v61  ;;  %1188 = vmatprep.subr.bf16.mxu1 %v1393_v61  ;;  %v613_v6 = vshrl.u32 %v612_v62, 7 }
 0x1c4   : > { %v595_v2 = vmul.f32 1.442695, %v571_v58  ;;  %v579_v3 = vmul.f32 1.442695, %v563_v59  ;;  %v597_v4 = vmul.f32 1.442695, %v572_v60  ;;  %1141 = vmatpush3.bf16.msra.mxu0 %v1393_v61  ;;  %1196 = vmatpush3.bf16.msra.mxu1 %v1393_v61  ;;  %v574_v38 = vsub.f32 %v1940_v37, %v2009_v57 }
 0x1c5   : > { %v581_v34 = vmul.f32 1.442695, %v564_v63  ;;  %v585_v5 = vmul.f32 1.442695, %v566_v0  ;;  %v583_v39 = vmul.f32 1.442695, %v565_v35  ;;  %v573_v36 = vsub.f32 %v1932_v33, %v2009_v57  ;;  %1142 = vmatprep.subr.bf16.mxu0 %v1394_v1  ;;  %1189 = vmatprep.subr.bf16.mxu1 %v1394_v1 }
 0x1c6   : > { %1403 = vpow2.f32 %v595_v2  ;;  %v601_v32 = vmul.f32 1.442695, %v574_v38  ;;  %v568_v7 = vsub.f32 %v1958_v46, %v2009_v57  ;;  %v567_v10 = vsub.f32 %v1950_v42, %v2009_v57  ;;  %v1395_v0 = vld [vmem:[#allocation9 + $0x28] sm:$0xff]  }
 0x1c7   : > { %1405 = vpow2.f32 %v579_v3  ;;  %v599_v9 = vmul.f32 1.442695, %v573_v36  ;;  %v614_v37 = vsub.s32 0, %v613_v6  ;;  %v576_v13 = vsub.f32 %v1960_v47, %v2009_v57 }
 0x1c8   : > { %1407 = vpow2.f32 %v597_v4  ;;  %1143 = vmatpush3.bf16.msra.mxu0 %v1394_v1  ;;  %1197 = vmatpush3.bf16.msra.mxu1 %v1394_v1  ;;  %v589_v33 = vmul.f32 1.442695, %v568_v7  ;;  %v587_v14 = vmul.f32 1.442695, %v567_v10  ;;  %v575_v46 = vsub.f32 %v1952_v43, %v2009_v57 }
 0x1c9   : > { %1409 = vpow2.f32 %v581_v34  ;;  %v2035_v16 = vand.u32 127, %v612_v62  ;;  %v605_v42 = vmul.f32 1.442695, %v576_v13  ;;  %v570_v17 = vsub.f32 %v1954_v44, %v2009_v57  ;;  %1144 = vmatprep.subr.bf16.mxu0 %v1395_v0  ;;  %1190 = vmatprep.subr.bf16.mxu1 %v1395_v0 }
 0x1ca   : > { %1411 = vpow2.f32 %v585_v5  ;;  %v603_v18 = vmul.f32 1.442695, %v575_v46  ;;  %v569_v47 = vsub.f32 %v1946_v40, %v2009_v57  ;;  %v578_v22 = vsub.f32 %v1956_v45, %v2009_v57  ;;  %v1396_v5 = vld [vmem:[#allocation9 + $0x20] sm:$0xff]  }
 0x1cb   : > { %1413 = vpow2.f32 %v583_v39  ;;  %vm635_vm0 = vcmp.lt.s32.totalorder %v2035_v16, 64  ;;  %v593_v21 = vmul.f32 1.442695, %v570_v17  ;;  %v577_v40 = vsub.f32 %v1948_v41, %v2009_v57 }
 0x1cc   : > { %1415 = vpow2.f32 %v601_v32  ;;  %v591_v24 = vmul.f32 1.442695, %v569_v47  ;;  %v609_v48 = vmul.f32 1.442695, %v578_v22  ;;  %1145 = vmatpush3.bf16.msra.mxu0 %v1395_v0  ;;  %1198 = vmatpush3.bf16.msra.mxu1 %v1395_v0 }
 0x1cd   : > { %1417 = vpow2.f32 %v599_v9  ;;  %v607_v11 = vmul.f32 1.442695, %v577_v40  ;;  %1146 = vmatprep.subr.bf16.mxu0 %v1396_v5  ;;  %1191 = vmatprep.subr.bf16.mxu1 %v1396_v5  ;;  %v1397_v9 = vld [vmem:[#allocation9 + $0x18] sm:$0xff]  }
 0x1ce   : > { %1419 = vpow2.f32 %v589_v33 }
 0x1cf   : > { %v1402_v15 = vpop.eup %1401  ;;  %1421 = vpow2.f32 %v587_v14  ;;  %v1398_v14 = vld [vmem:[#allocation9 + $0x10] sm:$0xff]  }
 0x1d0   : > { %v2037_v12 = vrot.slane %v1402_v15, %v614_v37  ;;  %1423 = vpow2.f32 %v605_v42  ;;  %1147 = vmatpush3.bf16.msra.mxu0 %v1396_v5  ;;  %1199 = vmatpush3.bf16.msra.mxu1 %v1396_v5  ;;  %v1399_v42 = vld [vmem:[#allocation9 + $0x8] sm:$0xff]  }
 0x1d1   : > { %1425 = vpow2.f32 %v603_v18  ;;  %1148 = vmatprep.subr.bf16.mxu0 %v1397_v9  ;;  %1192 = vmatprep.subr.bf16.mxu1 %v1397_v9 }
 0x1d2   : > { %1427 = vpow2.f32 %v593_v21 }
 0x1d3   : > { %v1404_v19 = vpop.eup %1403  ;;  %1429 = vpow2.f32 %v591_v24 }
 0x1d4   : > { %v1406_v20 = vpop.eup %1405  ;;  %v2045_v43 = vmul.f32 %v1404_v19, %v2037_v12  ;;  %1431 = vpow2.f32 %v609_v48  ;;  %1149 = vmatpush3.bf16.msra.mxu0 %v1397_v9  ;;  %1200 = vmatpush3.bf16.msra.mxu1 %v1397_v9 }
 0x1d5   : > { %v1408_v23 = vpop.eup %1407  ;;  %v2050_v44 = vmul.f32 %v1406_v20, %v2037_v12  ;;  %1433 = vpow2.f32 %v607_v11  ;;  %1150 = vmatprep.subr.bf16.mxu0 %v1398_v14  ;;  %1193 = vmatprep.subr.bf16.mxu1 %v1398_v14 }
 0x1d6   : > { %v1410_v25 = vpop.eup %1409  ;;  %v646_v26 = vsel %vm635_vm0, %v2045_v43, 0.0  ;;  %v2058_v27 = vmul.f32 %v1408_v23, %v2037_v12 }
 0x1d7   : > { %v1412_v28 = vpop.eup %1411  ;;  %670 = vadd.xlane.f32.xlu1 %v646_v26  ;;  %v638_v45 = vsel %vm635_vm0, %v2050_v44, 0.0  ;;  %v2064_v29 = vmul.f32 %v1410_v25, %v2037_v12 }
 0x1d8   : > { %v1414_v30 = vpop.eup %1413  ;;  %654 = vadd.xlane.f32.xlu0 %v638_v45  ;;  %v647_v41 = vsel %vm635_vm0, %v2058_v27, 0.0  ;;  %v2070_v31 = vmul.f32 %v1412_v28, %v2037_v12  ;;  %1151 = vmatpush3.bf16.msra.mxu0 %v1398_v14 }
 0x1d9   : > { %v1416_v49 = vpop.eup %1415  ;;  %v639_v50 = vsel %vm635_vm0, %v2064_v29, 0.0  ;;  %v2076_v8 = vmul.f32 %v1414_v30, %v2037_v12  ;;  %1201 = vmatpush3.bf16.msra.mxu1 %v1398_v14  ;;  %1152 = vmatprep.subr.bf16.mxu0 %v1399_v42 }
 0x1da   : > { %v1418_v51 = vpop.eup %1417  ;;  %v641_v52 = vsel %vm635_vm0, %v2070_v31, 0.0  ;;  %v2082_v53 = vmul.f32 %v1416_v49, %v2037_v12  ;;  %1194 = vmatprep.subr.bf16.mxu1 %v1399_v42 }
 0x1db   : > { %672 = vadd.xlane.f32.xlu1 %v647_v41  ;;  %v1420_v54 = vpop.eup %1419  ;;  %v640_v55 = vsel %vm635_vm0, %v2076_v8, 0.0  ;;  %v2088_v56 = vmul.f32 %v1418_v51, %v2037_v12 }
 0x1dc   : > { %656 = vadd.xlane.f32.xlu0 %v639_v50  ;;  %v1422_v57 = vpop.eup %1421  ;;  %v649_v58 = vsel %vm635_vm0, %v2082_v53, 0.0  ;;  %v2094_v59 = vmul.f32 %v1420_v54, %v2037_v12  ;;  %1153 = vmatpush3.bf16.msra.mxu0 %v1399_v42 }
 0x1dd   : > { %v1424_v60 = vpop.eup %1423  ;;  %v648_v61 = vsel %vm635_vm0, %v2088_v56, 0.0  ;;  %v2100_v62 = vmul.f32 %v1422_v57, %v2037_v12  ;;  %1202 = vmatpush3.bf16.msra.mxu1 %v1399_v42 }
 0x1de   : > { %v1426_v63 = vpop.eup %1425  ;;  %v643_v1 = vsel %vm635_vm0, %v2094_v59, 0.0  ;;  %v2106_v2 = vmul.f32 %v1424_v60, %v2037_v12 }
 0x1df   : > { %660 = vadd.xlane.f32.xlu1 %v641_v52  ;;  %v1428_v3 = vpop.eup %1427  ;;  %v642_v4 = vsel %vm635_vm0, %v2100_v62, 0.0  ;;  %v2112_v35 = vmul.f32 %v1426_v63, %v2037_v12 }
 0x1e0   : > { %658 = vadd.xlane.f32.xlu0 %v640_v55  ;;  %v1430_v34 = vpop.eup %1429  ;;  %v651_v39 = vsel %vm635_vm0, %v2106_v2, 0.0  ;;  %v2118_v38 = vmul.f32 %v1428_v3, %v2037_v12 }
 0x1e1   : > { %v1432_v36 = vpop.eup %1431  ;;  %v650_v6 = vsel %vm635_vm0, %v2112_v35, 0.0  ;;  %v2124_v32 = vmul.f32 %v1430_v34, %v2037_v12 }
 0x1e2   : > { %v1434_v7 = vpop.eup %1433  ;;  %v645_v10 = vsel %vm635_vm0, %v2118_v38, 0.0  ;;  %v2130_v37 = vmul.f32 %v1432_v36, %v2037_v12 }
 0x1e3   : > { %676 = vadd.xlane.f32.xlu1 %v649_v58  ;;  %v644_v33 = vsel %vm635_vm0, %v2124_v32, 0.0  ;;  %v2136_v13 = vmul.f32 %v1434_v7, %v2037_v12  ;;  %v1400_v12 = vld [vmem:[#allocation9] sm:$0xff]  }
 0x1e4   : > { %674 = vadd.xlane.f32.xlu0 %v648_v61  ;;  %v653_v46 = vsel %vm635_vm0, %v2130_v37, 0.0  ;;  %1154 = vmatprep.subr.bf16.mxu0 %v1400_v12 }
 0x1e5   : > { %v652_v15 = vsel %vm635_vm0, %v2136_v13, 0.0  ;;  %1195 = vmatprep.subr.bf16.mxu1 %v1400_v12  ;;  %1155 = vmatpush3.bf16.msra.mxu0 %v1400_v12 }
 0x1e6   : > { %1203 = vmatpush3.bf16.msra.mxu1 %v1400_v12 }
 0x1e7   : > { %664 = vadd.xlane.f32.xlu1 %v643_v1 }
 0x1e8   : > { %662 = vadd.xlane.f32.xlu0 %v642_v4 }
 0x1eb   : > { %680 = vadd.xlane.f32.xlu1 %v651_v39 }
 0x1ec   : > { %678 = vadd.xlane.f32.xlu0 %v650_v6 }
 0x1ef   : > { %668 = vadd.xlane.f32.xlu1 %v645_v10 }
 0x1f0   : > { %666 = vadd.xlane.f32.xlu0 %v644_v33 }
 0x1f3   : > { %684 = vadd.xlane.f32.xlu1 %v653_v46 }
 0x1f4   : > { %682 = vadd.xlane.f32.xlu0 %v652_v15 }
 0x260   : > { %v671_v17 = vpop.xlane.xlu1 %670 }
 0x261   : > { %v655_v18 = vpop.xlane.xlu0 %654  ;;  %1435 = vrcp.f32 %v671_v17 }
 0x262   : > { %1437 = vrcp.f32 %v655_v18 }
 0x264   : > { %v673_v16 = vpop.xlane.xlu1 %672 }
 0x265   : > { %1439 = vrcp.f32 %v673_v16  ;;  %v657_v47 = vpop.xlane.xlu0 %656 }
 0x266   : > { %1441 = vrcp.f32 %v657_v47 }
 0x268   : > { %v661_v19 = vpop.xlane.xlu1 %660 }
 0x269   : > { %1443 = vrcp.f32 %v661_v19  ;;  %v659_v20 = vpop.xlane.xlu0 %658 }
 0x26a   : > { %1445 = vrcp.f32 %v659_v20 }
 0x26c   : > { %v677_v21 = vpop.xlane.xlu1 %676 }
 0x26d   : > { %1447 = vrcp.f32 %v677_v21  ;;  %v675_v22 = vpop.xlane.xlu0 %674 }
 0x26e   : > { %1449 = vrcp.f32 %v675_v22  ;;  %v1436_v23 = vpop.eup %1435 }
 0x26f   : > { %v1438_v40 = vpop.eup %1437  ;;  %v710_v45 = vmul.f32 %v1436_v23, %v2045_v43 }
 0x270   : > { %v665_v24 = vpop.xlane.xlu1 %664  ;;  %v702_v48 = vmul.f32 %v1438_v40, %v2050_v44 }
 0x271   : > { %1451 = vrcp.f32 %v665_v24  ;;  %v663_v25 = vpop.xlane.xlu0 %662 }
 0x272   : > { %v1440_v26 = vpop.eup %1439  ;;  %1453 = vrcp.f32 %v663_v25 }
 0x273   : > { %v1442_v28 = vpop.eup %1441  ;;  %v711_v30 = vmul.f32 %v1440_v26, %v2058_v27 }
 0x274   : > { %v681_v41 = vpop.xlane.xlu1 %680  ;;  %v703_v49 = vmul.f32 %v1442_v28, %v2064_v29 }
 0x275   : > { %1455 = vrcp.f32 %v681_v41  ;;  %v679_v50 = vpop.xlane.xlu0 %678  ;;  %v722_v11 = vpack.c.bf16 %v711_v30, %v710_v45 }
 0x276   : > { %v1444_v51 = vpop.eup %1443  ;;  %1457 = vrcp.f32 %v679_v50  ;;  %v718_v52 = vpack.c.bf16 %v703_v49, %v702_v48 }
 0x277   : > { %v1446_v54 = vpop.eup %1445  ;;  %1164 = vmatprep.mubr.bf16.mxu1 %v722_v11  ;;  %v705_v55 = vmul.f32 %v1444_v51, %v2070_v31 }
 0x278   : > { %1156 = vmatprep.mubr.bf16.mxu0 %v718_v52  ;;  %v669_v57 = vpop.xlane.xlu1 %668  ;;  %v704_v43 = vmul.f32 %v1446_v54, %v2076_v8 }
 0x279   : > { %1459 = vrcp.f32 %v669_v57  ;;  %v667_v27 = vpop.xlane.xlu0 %666 }
 0x27a   : > { %v1448_v58 = vpop.eup %1447  ;;  %1461 = vrcp.f32 %v667_v27  ;;  %v719_v44 = vpack.c.bf16 %v705_v55, %v704_v43 }
 0x27b   : > { %v1450_v29 = vpop.eup %1449  ;;  %v713_v60 = vmul.f32 %v1448_v58, %v2082_v53 }
 0x27c   : > { %1157 = vmatmul.mubr.bf16.vlgmr.msra.gmra.mxu0 %v719_v44  ;;  %v685_v61 = vpop.xlane.xlu1 %684  ;;  %v712_v63 = vmul.f32 %v1450_v29, %v2088_v56 }
 0x27d   : > { %1463 = vrcp.f32 %v685_v61  ;;  %v683_v0 = vpop.xlane.xlu0 %682 }
 0x27e   : > { %v1452_v1 = vpop.eup %1451  ;;  %1465 = vrcp.f32 %v683_v0  ;;  %v723_v31 = vpack.c.bf16 %v713_v60, %v712_v63 }
 0x27f   : > { %v1454_v3 = vpop.eup %1453  ;;  %v707_v8 = vmul.f32 %v1452_v1, %v2094_v59 }
 0x280   : > { %1165 = vmatmul.mubr.bf16.vlgmr.msra.gmra.mxu1 %v723_v31  ;;  %v706_v4 = vmul.f32 %v1454_v3, %v2100_v62 }
 0x282   : > { %v1456_v34 = vpop.eup %1455  ;;  %v720_v5 = vpack.c.bf16 %v707_v8, %v706_v4 }
 0x283   : > { %v1458_v39 = vpop.eup %1457  ;;  %v715_v53 = vmul.f32 %v1456_v34, %v2106_v2 }
 0x284   : > { %1160 = vmatprep.mubr.bf16.mxu0 %v720_v5  ;;  %v714_v36 = vmul.f32 %v1458_v39, %v2112_v35 }
 0x286   : > { %v1460_v56 = vpop.eup %1459  ;;  %v724_v6 = vpack.c.bf16 %v715_v53, %v714_v36 }
 0x287   : > { %v1462_v7 = vpop.eup %1461  ;;  %v709_v9 = vmul.f32 %v1460_v56, %v2118_v38 }
 0x288   : > { %1168 = vmatprep.mubr.bf16.mxu1 %v724_v6  ;;  %v708_v59 = vmul.f32 %v1462_v7, %v2124_v32 }
 0x28a   : > { %v1464_v62 = vpop.eup %1463  ;;  %v721_v10 = vpack.c.bf16 %v709_v9, %v708_v59 }
 0x28b   : > { %v1466_v33 = vpop.eup %1465  ;;  %v717_v2 = vmul.f32 %v1464_v62, %v2130_v37 }
 0x28c   : > { %1161 = vmatmul.mubr.bf16.gmra.mxu0 %v721_v10  ;;  %v716_v35 = vmul.f32 %v1466_v33, %v2136_v13 }
 0x28e   : > { %v725_v14 = vpack.c.bf16 %v717_v2, %v716_v35 }
 0x290   : > { %1169 = vmatmul.mubr.bf16.gmra.mxu1 %v725_v14 }
 0x33c   : > { %v1158_v38 = vpop.f32.mrf.mxu0 }
 0x33d   : > { %889 = vst [vmem:[%s1963_s27 + $0x10] sm:$0xff] %v1158_v38 }
 0x33e   : > { %v824_v46 = vpop.f32.mrf.mxu0 }
 0x33f   : > { %887 = vst [vmem:[%s1963_s27] sm:$0xff] %v824_v46 }
 0x340   : > { %v1159_v32 = vpop.f32.mrf.mxu0  ;;  %v1166_v15 = vpop.f32.mrf.mxu1 }
 0x341   : > { %890 = vst [vmem:[%s1963_s27 + $0x18] sm:$0xff] %v1159_v32  ;;  %897 = vst [vmem:[%s1963_s27 + $0x50] sm:$0xff] %v1166_v15 }
 0x342   : > { %v827_v37 = vpop.f32.mrf.mxu0  ;;  %v856_v42 = vpop.f32.mrf.mxu1 }
 0x343   : > { %888 = vst [vmem:[%s1963_s27 + $0x8] sm:$0xff] %v827_v37  ;;  %895 = vst [vmem:[%s1963_s27 + $0x40] sm:$0xff] %v856_v42 }
 0x344   : > { %v1167_v13 = vpop.f32.mrf.mxu1 }
 0x345   : > { %898 = vst [vmem:[%s1963_s27 + $0x58] sm:$0xff] %v1167_v13 }
 0x346   : > { %v859_v12 = vpop.f32.mrf.mxu1 }
 0x347   : > { %896 = vst [vmem:[%s1963_s27 + $0x48] sm:$0xff] %v859_v12 }
 0x34c   : > { %v1162_v17 = vpop.f32.mrf.mxu0 }
 0x34d   : > { %893 = vst [vmem:[%s1963_s27 + $0x30] sm:$0xff] %v1162_v17 }
 0x34e   : > { %v840_v18 = vpop.f32.mrf.mxu0 }
 0x34f   : > { %891 = vst [vmem:[%s1963_s27 + $0x20] sm:$0xff] %v840_v18 }
 0x350   : > { %v1163_v16 = vpop.f32.mrf.mxu0  ;;  %v1170_v47 = vpop.f32.mrf.mxu1 }
 0x351   : > { %894 = vst [vmem:[%s1963_s27 + $0x38] sm:$0xff] %v1163_v16  ;;  %901 = vst [vmem:[%s1963_s27 + $0x70] sm:$0xff] %v1170_v47 }
 0x352   : > { %v843_v19 = vpop.f32.mrf.mxu0  ;;  %v872_v20 = vpop.f32.mrf.mxu1 }
 0x353   : > { %892 = vst [vmem:[%s1963_s27 + $0x28] sm:$0xff] %v843_v19  ;;  %899 = vst [vmem:[%s1963_s27 + $0x60] sm:$0xff] %v872_v20 }
 0x354   : > { %v1171_v21 = vpop.f32.mrf.mxu1 }
 0x355   : > { %902 = vst [vmem:[%s1963_s27 + $0x78] sm:$0xff] %v1171_v21 }
 0x356   : > { %v875_v22 = vpop.f32.mrf.mxu1 }
 0x357   : > { %900 = vst [vmem:[%s1963_s27 + $0x68] sm:$0xff] %v875_v22 }
 0x358 PF: > { %s2309_s9 = sld [smem:[#allocation17_spill]]  ;;  %s920_s12 = sshll.u32 %s1963_s27, 4  ;;  %s2180_s12 = int_to_ptr.vmem [resolvable:$true] %s920_s12 }
 0x359   : > { %s2310_s11 = sld [smem:[#allocation16_spill]]  ;;  %s2189_s21 = scalar_lea.sflag [#allocation6], %s242_s30 }
 0x35a   : > { %s2311_s25 = sld [smem:[#allocation18_spill]]  ;;  %s1547_s5 = scalar_lea.vmem %s2180_s12, 2048 }
 0x35b   : > { %s2313_s1 = sld [smem:[#allocation21_spill]]  ;;  %p1548_p2 = scmp.ne.s32.totalorder %s2180_s12, %s1547_s5 }
 0x35c   : > { %s2314_s26 = sld [smem:[#allocation27_spill]]  ;;  %s1698_s27 = smov [#allocation10]  }
 0x35d   : > { %s1551_s29 = sshll.u32 %s1698_s27, 4  ;;  %s1552_s29 = int_to_ptr.vmem [resolvable:$false] %s1551_s29 }
 0x35e   : > { %s1553_s6 = scalar_lea.vmem %s1552_s29, 4096  ;;  %p1554_p1 = scmp.lt.s32.totalorder %s2180_s12, %s1552_s29 }
 0x35f   : > { %s911_s2 = smul.u32 %s2310_s11, %s2309_s9  ;;  %p1555_p7 = scmp.lt.s32.totalorder %s1553_s6, %s1547_s5 }
 0x360   : > { %s1072_s3 = sshll.u32 %s2311_s25, 5 }
 0x361   : > { %s1071_s18 = sshll.u32 %s911_s2, 4  ;;  %p2315_p4 = scmp.ne.s32.totalorder %s2313_s1, 0 }
 0x362   : > { %s917_s13 = sadd.s32 %s1072_s3, %s1071_s18  ;;  %p1556_p9 = por %p1555_p7, %p1554_p1 }
 0x363   : > { %s1073_s19 = sshll.u32 %s917_s13, 7  ;;  %p1549_p6 = pnand %p1548_p2, %p2315_p4 }
 0x364   : > { %s2185_s28 = scalar_lea.hbm %s2314_s26, %s1073_s19 }
 0x365   : > { %p1550_p5 = pneg %p1549_p6 }
 0x367   : > { %p1557_p0 = pnand %p1556_p9, %p1550_p5 }
 0x369   : > { %1560 = shalt.err (!%p1557_p0)
}
 0x36a   : > { %s1561_s30 = scalar_lea.hbm %s2185_s28, 2048  ;;  %s1565_s11 = scalar_lea.hbm %s2314_s26, 8192 }
 0x36b   : > { %p1562_p10 = scmp.ne.s32.totalorder %s2185_s28, %s1561_s30  ;;  %p1566_p3 = scmp.lt.s32.totalorder %s2185_s28, %s2314_s26 }
 0x36c   : > { %p1567_p11 = scmp.lt.s32.totalorder %s1565_s11, %s1561_s30 }
 0x36d   : > { %p1563_p12 = pnand %p1562_p10, %p2315_p4 }
 0x36e   : > { %p1568_p8 = por %p1567_p11, %p1566_p3 }
 0x36f   : > { %p1564_p13 = pneg %p1563_p12 }
 0x371   : > { %p1569_p2 = pnand %p1568_p8, %p1564_p13 }
 0x373   : > { %1572 = shalt.err (!%p1569_p2)
}
 0x374   : > { %s1699_s2 = smov 128   ;;  %s1700_s3 = smov 8  }
 0x375   : > { %1214 = dma.vmem_to_hbm [thread:$0]  (%p2315_p4), %s2180_s12, 2048, %s2185_s28, %s2189_s21, %s1699_s2, %s1699_s2, %s1700_s3  }
 0x376 PF: > { %s2316_s18 = sld [smem:[#allocation14_spill]]  ;;  %p1236_p6 = scmp.ge.s32.totalorder %s1687_s24, 2 }
 0x377   : > { %s2317_s13 = sld [smem:[#allocation22_spill]] }
 0x37c   : > { %s935_s19 = sand.u32 1, %s2316_s18  }
 0x37d   : > { %p2318_p5 = scmp.ne.s32.totalorder %s2317_s13, 0  ;;  %s936_s4 = scalar_lea.sflag [#allocation6], %s935_s19 }
 0x37f   : > { %p1228_p1 = pnand %p1236_p6, %p2318_p5 }
 0x381   : > { %p1229_p7 = pneg %p1228_p1 }
 0x383   : > { %1634 = dma.done.wait (%p1229_p7), %s936_s4, 2048  }
 0x384   : > { %1636 = vsyncadd (%p1229_p7), %s936_s4, 4294965248  ;;  %s20_s24 = sadd.s32 1, %s1687_s24   ;;  %s2320_s12 = sld [smem:[#allocation15_spill]] }
 0x385   : > { %p2217_p9 = scmp.ge.s32.totalorder %s20_s24, 10   ;;  %s2321_s18 = sld [smem:[#allocation19_spill]] }
 0x386   : > { %s2322_s19 = sld [smem:[#allocation20_spill]]  ;;  %s2325_s13 = smov %s1647_s14 }
 0x387   : > { %s2323_s21 = sld [smem:[#allocation23_spill]]  ;;  %s2326_s14 = smov %s1879_s10 }
 0x388   : > { %s2324_s22 = sld [smem:[#allocation24_spill]]  ;;  %s2327_s15 = smov %s1655_s16 }
 0x389   : > { %s2328_s16 = smov %s1659_s17  ;;  %s2329_s17 = smov %s1874_s20 }
 0x38a   : > { %s2330_s20 = smov %s1683_s23  ;;  %s2331_s23 = smov %s2341_s8 }
 0x38b   :  { %19 = sbr.rel (!%p2217_p9) target bundleno = 15 (0xf), region = 97 }
 0x390   :  { %941 = vsyncpa [#allocation5], 1 }
 0x391   :  { %943 = vsyncpa [#allocation5 + $0x1], 1 }
 0x392   :  { %944 = vsyncpa [#allocation8], 1 }
 0x393   :  { %945 = vsyncpa [#allocation6], 1 }
 0x394   :  { %947 = vsyncpa [#allocation6 + $0x1], 1 }

</bundles_post_ra>
